<compile_context>
chip_gen: v5e
topology: v5e:2x2
jax: 0.10.0
libtpu: 0.0.40
codegen_flags: <defaults>
</compile_context>

<pallas_src>
import functools
import math

import jax
import jax.numpy as jnp
from jax.experimental import pallas as pl
from jax.experimental.pallas import tpu as pltpu

# After ~30 halvings the bisection width is below f32 resolution of the bracket.
_F32_CONVERGED_ITERS = 30


def _round_up(x, m):
    return ((x + m - 1) // m) * m


def _entmax_bisect_kernel(x_ref, o_ref, *, alpha, n_iter, d, axis, bf16_eup):
    """Bisection entmax on one VMEM tile; reduction along `axis` of the block."""
    X = x_ref[...].astype(jnp.float32)
    X = (alpha - 1.0) * X

    m_val = jnp.max(X, axis=axis, keepdims=True)
    t_min = m_val - 1.0
    t_max = m_val - float(d) ** (1.0 - alpha)
    diff = t_max - t_min

    # Exponent is 1/(d-1) exactly as written in the reference forward
    # (NOT the canonical 1/(alpha-1)); replicated faithfully.
    exponent = 1.0 / (d - 1)

    if d == 2:
        # exponent == 1: pure VPU, zero transcendentals per iteration.
        def z_at(t):
            return jnp.maximum(X - t, 0.0)
    elif d == 3:
        # exponent == 1/2: a single EUP op per element per iteration.
        def z_at(t):
            return jnp.sqrt(jnp.maximum(X - t, 0.0))
    else:
        def z_at(t):
            u = jnp.maximum(X - t, 0.0)
            # clamp-to-zero + log/exp: log(0) = -inf, e*(-inf) = -inf,
            # exp(-inf) = 0, so no extra compare+select is needed.
            if bf16_eup:
                # Optional reduced-precision EUP path (v6e/v7x bf16 EUP only).
                lg = jnp.log(u.astype(jnp.bfloat16)).astype(jnp.float32)
            else:
                lg = jnp.log(u)
            return jnp.exp(exponent * lg)

    def body(_, carry):
        t_lo, width, _t_last, _s_last = carry
        width = width * 0.5
        t = t_lo + width
        Z = z_at(t)
        s = jnp.sum(Z, axis=axis, keepdims=True)
        t_lo = jnp.where(s - 1.0 >= 0.0, t, t_lo)
        # Carry only per-row columns (no tile-sized Z through the loop).
        return (t_lo, width, t, s)

    init = (t_min, diff, t_min, jnp.ones_like(t_min))
    _, _, t_last, s_last = jax.lax.fori_loop(0, n_iter, body, init)

    # Reference returns Z evaluated at the last iteration's t, normalized by its sum.
    Z = z_at(t_last)
    inv = pl.reciprocal(s_last, approx=False)
    o_ref[...] = (Z * inv).astype(o_ref.dtype)


def _vmem_limit(block_elems, io_itemsize):
    """Derive a safe scoped-VMEM limit from the actual tile footprint."""
    blk_f32 = block_elems * 4
    io_blk = block_elems * io_itemsize
    est = 4 * io_blk + 8 * blk_f32 + 2 * 1024 * 1024  # dbl-buffered io + temps + headroom
    return int(min(48 * 1024 * 1024, max(16 * 1024 * 1024, est)))


@functools.partial(
    jax.jit,
    static_argnames=("alpha", "dim", "n_iter", "exact_n_iter", "bf16_transcendentals"),
)
def _entmax_bisect_impl(x, *, alpha, dim, n_iter, exact_n_iter, bf16_transcendentals):
    orig_dtype = x.dtype
    ndim = x.ndim
    dim = dim % ndim

    x_moved = jnp.moveaxis(x, dim, -1)
    moved_shape = x_moved.shape
    d = int(moved_shape[-1])
    rows = int(math.prod(moved_shape[:-1])) if moved_shape[:-1] else 1
    x2d = x_moved.reshape(rows, d)

    eff_iter = int(n_iter) if exact_n_iter else min(int(n_iter), _F32_CONVERGED_ITERS)
    kernel_args = dict(
        alpha=float(alpha), n_iter=eff_iter, d=d, bf16_eup=bool(bf16_transcendentals)
    )

    if d < 128:
        # Lane-dense layout: rows -> lane axis (128-wide), D -> sublanes.
        # Full lane utilization and unmasked output stores even for tiny D.
        rows128 = _round_up(rows, 128)
        max_ct_vmem = max(128, ((4 * 1024 * 1024) // (d * 4)) // 128 * 128)
        LANE_TILE_MIN, LANE_TILE_CAP = 1024, 8192
        ct = min(LANE_TILE_CAP, rows128, max_ct_vmem)
        if rows128 >= 2 * LANE_TILE_MIN:
            # Give the "parallel" grid axis >= 2-4 steps (v7x megacore) without
            # shrinking tiles below LANE_TILE_MIN (keeps the EUP pipeline fed).
            ct = min(ct, max(LANE_TILE_MIN, (rows128 // 4) // 128 * 128))
        rows_pad = _round_up(rows, ct)

        # TODO(synk): the transpose/pad/slice stay in XLA (fused under this jit)
        # rather than as in-kernel XLU transposes: Mosaic's 2-D transpose of a
        # (ct, d) tile with d not 128-aligned is not reliably supported.
        xt = x2d.T  # (d, rows)
        if rows_pad != rows:
            xt = jnp.pad(xt, ((0, 0), (0, rows_pad - rows)))

        kernel = functools.partial(_entmax_bisect_kernel, axis=0, **kernel_args)
        out_t = pl.pallas_call(
            kernel,
            out_shape=jax.ShapeDtypeStruct((d, rows_pad), orig_dtype),
            grid=(rows_pad // ct,),
            in_specs=[pl.BlockSpec((d, ct), lambda i: (0, i))],
            out_specs=pl.BlockSpec((d, ct), lambda i: (0, i)),
            compiler_params=pltpu.CompilerParams(
                dimension_semantics=("parallel",),
                vmem_limit_bytes=_vmem_limit(ct * d, jnp.dtype(orig_dtype).itemsize),
            ),
        )(xt)
        out2d = out_t[:, :rows].T
    else:
        # D on lanes; rows on sublanes.
        sub = {4: 8, 2: 16, 1: 32}.get(jnp.dtype(orig_dtype).itemsize, 8)
        rows_sub = _round_up(rows, sub)
        max_tr_vmem = max(sub, ((4 * 1024 * 1024) // (d * 4)) // sub * sub)
        ROW_TILE_MIN = max(sub, 64)
        tr = min(1024, rows_sub, max_tr_vmem)
        if rows_sub >= 2 * ROW_TILE_MIN:
            tr = min(tr, max(ROW_TILE_MIN, (rows_sub // 4) // sub * sub))
        rows_pad = _round_up(rows, tr)

        xp = x2d
        if rows_pad != rows:
            xp = jnp.pad(xp, ((0, rows_pad - rows), (0, 0)))

        kernel = functools.partial(_entmax_bisect_kernel, axis=-1, **kernel_args)
        out_p = pl.pallas_call(
            kernel,
            out_shape=jax.ShapeDtypeStruct((rows_pad, d), orig_dtype),
            grid=(rows_pad // tr,),
            in_specs=[pl.BlockSpec((tr, d), lambda i: (i, 0))],
            out_specs=pl.BlockSpec((tr, d), lambda i: (i, 0)),
            compiler_params=pltpu.CompilerParams(
                dimension_semantics=("parallel",),
                vmem_limit_bytes=_vmem_limit(tr * d, jnp.dtype(orig_dtype).itemsize),
            ),
        )(xp)
        out2d = out_p[:rows]

    out = out2d.reshape(moved_shape)
    return jnp.moveaxis(out, -1, dim)


def entmax_bisect(x, alpha=1.5, dim=-1, n_iter=50, *, exact_n_iter=False,
                  bf16_transcendentals=False):
    """Pallas-TPU entmax-bisect forward. Reduction along `dim`.

    `exact_n_iter=True` runs the literal n_iter bisection steps (reference
    behavior); by default the loop is capped at 30 steps, which already reaches
    f32 convergence. `bf16_transcendentals=True` is an optional reduced-accuracy
    fast path for v6e/v7x only (bf16 EUP); do not use on v5e.
    """
    # TODO(synk): EntmaxBisect.__init__ defaults n_iter=None (which would crash
    # range(None) in PyTorch); we map None to BisectionFunction's default of 50.
    if n_iter is None:
        n_iter = 50
    d = int(x.shape[dim])
    if d < 2:
        # The reference's 1/(d-1) exponent is undefined for d == 1.
        raise ValueError("entmax_bisect requires the reduction dim size >= 2")
    return _entmax_bisect_impl(
        x, alpha=float(alpha), dim=int(dim), n_iter=int(n_iter),
        exact_n_iter=bool(exact_n_iter),
        bf16_transcendentals=bool(bf16_transcendentals),
    )


@functools.partial(jax.jit, static_argnames=("alpha", "dim", "n_iter"))
def _entmax_bisect_ref(x, alpha=1.5, dim=-1, n_iter=50):
    """Pure-JAX reference mirroring the PyTorch BisectionFunction.forward."""
    x = x.astype(jnp.float32)
    d = x.shape[dim]
    X = (alpha - 1.0) * x
    m_val = jnp.max(X, axis=dim, keepdims=True)
    t_min = m_val - 1.0
    t_max = m_val - float(d) ** (1.0 - alpha)
    diff = t_max - t_min
    exponent = 1.0 / (d - 1)
    Z = jnp.zeros_like(X)
    for _ in range(n_iter):
        diff = diff / 2.0
        t = t_min + diff
        Z = jnp.power(jnp.maximum(X - t, 0.0), exponent)
        mask = (jnp.sum(Z, axis=dim, keepdims=True) - 1.0) >= 0.0
        t_min = jnp.where(mask, t, t_min)
    return Z / jnp.sum(Z, axis=dim, keepdims=True)


if __name__ == "__main__":
    key = jax.random.PRNGKey(0)
    # NCHW-like input; entmax applied along the last axis (dim=-1).
    x = jax.random.normal(key, (2, 4, 16, 16), dtype=jnp.float32)

    out = entmax_bisect(x, alpha=1.5, dim=-1, n_iter=50)
    out = jax.block_until_ready(out)
    assert out.shape == x.shape and out.dtype == x.dtype

    # Kernel-math check: reference with the same effective iteration count.
    ref_same = _entmax_bisect_ref(x, alpha=1.5, dim=-1, n_iter=_F32_CONVERGED_ITERS)
    assert jnp.allclose(out, ref_same, atol=1e-5, rtol=1e-5)
    # Convergence check vs. the full 50-iteration reference loop.
    ref_full = _entmax_bisect_ref(x, alpha=1.5, dim=-1, n_iter=50)
    assert jnp.allclose(out, ref_full, atol=5e-4, rtol=1e-3)
    # Rows should (approximately) sum to 1 after normalization.
    assert jnp.allclose(jnp.sum(out, axis=-1), 1.0, atol=1e-5)

    # Exercise the specialized d==2 (no EUP) and d==3 (sqrt) paths.
    x2 = jax.random.normal(jax.random.PRNGKey(2), (32, 2), dtype=jnp.float32)
    out2 = jax.block_until_ready(entmax_bisect(x2, alpha=1.5, dim=-1, n_iter=50))
    assert jnp.allclose(out2, _entmax_bisect_ref(x2, alpha=1.5, dim=-1, n_iter=50),
                        atol=1e-5, rtol=1e-5)
    x3 = jax.random.normal(jax.random.PRNGKey(1), (64, 3), dtype=jnp.float32)
    out3 = jax.block_until_ready(entmax_bisect(x3, alpha=1.5, dim=-1, n_iter=50))
    assert jnp.allclose(out3, _entmax_bisect_ref(x3, alpha=1.5, dim=-1, n_iter=50),
                        atol=1e-4, rtol=1e-4)

    # Exercise the d >= 128 (rows-on-sublanes) branch.
    xl = jax.random.normal(jax.random.PRNGKey(3), (16, 256), dtype=jnp.float32)
    outl = jax.block_until_ready(entmax_bisect(xl, alpha=1.5, dim=-1, n_iter=50))
    refl = _entmax_bisect_ref(xl, alpha=1.5, dim=-1, n_iter=_F32_CONVERGED_ITERS)
    assert jnp.allclose(outl, refl, atol=1e-5, rtol=1e-5)
    assert jnp.allclose(jnp.sum(outl, axis=-1), 1.0, atol=1e-5)

    print("KERNEL_OK")
</pallas_src>

<mosaic_0001>
module attributes {stable_mosaic.version = 11 : i64} {
  func.func @_entmax_bisect_kernel(%arg0: i32, %arg1: memref<16x128xf32, #tpu.memory_space<vmem>>, %arg2: memref<16x128xf32, #tpu.memory_space<vmem>>) attributes {dimension_semantics = [#tpu.dimension_semantics<parallel>], iteration_bounds = array<i64: 1>, scalar_prefetch = 0 : i64, scratch_operands = 0 : i64, tpu.core_type = #tpu.core_type<tc>, window_params = [{transform_indices = @transform_0, window_bounds = array<i64: 16, 128>}, {transform_indices = @transform_1, window_bounds = array<i64: 16, 128>}]} {
    %c0 = arith.constant 0 : index
    %c0_0 = arith.constant 0 : index
    %0 = vector.load %arg1[%c0, %c0_0] : memref<16x128xf32, #tpu.memory_space<vmem>>, vector<16x128xf32>
    %cst = arith.constant 5.000000e-01 : f32
    %1 = vector.broadcast %cst : f32 to vector<16x128xf32>
    %2 = arith.mulf %1, %0 : vector<16x128xf32>
    %cst_1 = arith.constant dense<0xFF800000> : vector<128xf32>
    %3 = vector.multi_reduction <maximumf>, %2, %cst_1 [0] : vector<16x128xf32> to vector<128xf32>
    %4 = vector.shape_cast %3 : vector<128xf32> to vector<1x128xf32>
    %cst_2 = arith.constant 1.000000e+00 : f32
    %5 = vector.broadcast %cst_2 : f32 to vector<1x128xf32>
    %6 = arith.subf %4, %5 : vector<1x128xf32>
    %cst_3 = arith.constant 2.500000e-01 : f32
    %7 = vector.broadcast %cst_3 : f32 to vector<1x128xf32>
    %8 = arith.subf %4, %7 : vector<1x128xf32>
    %9 = arith.subf %8, %6 : vector<1x128xf32>
    %cst_4 = arith.constant 1.000000e+00 : f32
    %10 = vector.broadcast %cst_4 : f32 to vector<1x128xf32>
    %c0_i32 = arith.constant 0 : i32
    %c30_i32 = arith.constant 30 : i32
    %11 = arith.addi %c0_i32, %c30_i32 : i32
    %c1_i32 = arith.constant 1 : i32
    %12:4 = scf.for %arg3 = %c0_i32 to %11 step %c1_i32 iter_args(%arg4 = %6, %arg5 = %9, %arg6 = %6, %arg7 = %10) -> (vector<1x128xf32>, vector<1x128xf32>, vector<1x128xf32>, vector<1x128xf32>)  : i32 {
      %cst_9 = arith.constant 5.000000e-01 : f32
      %25 = vector.broadcast %cst_9 : f32 to vector<1x128xf32>
      %26 = arith.mulf %arg5, %25 : vector<1x128xf32>
      %27 = arith.addf %arg4, %26 : vector<1x128xf32>
      %28 = vector.broadcast %27 : vector<1x128xf32> to vector<16x128xf32>
      %29 = arith.subf %2, %28 : vector<16x128xf32>
      %cst_10 = arith.constant 0.000000e+00 : f32
      %30 = vector.broadcast %cst_10 : f32 to vector<16x128xf32>
      %31 = arith.maximumf %29, %30 : vector<16x128xf32>
      %32 = math.log %31 : vector<16x128xf32>
      %cst_11 = arith.constant 0.0666666701 : f32
      %33 = vector.broadcast %cst_11 : f32 to vector<16x128xf32>
      %34 = arith.mulf %33, %32 : vector<16x128xf32>
      %35 = math.exp %34 : vector<16x128xf32>
      %cst_12 = arith.constant dense<0.000000e+00> : vector<128xf32>
      %36 = vector.multi_reduction <add>, %35, %cst_12 [0] : vector<16x128xf32> to vector<128xf32>
      %37 = vector.shape_cast %36 : vector<128xf32> to vector<1x128xf32>
      %cst_13 = arith.constant 1.000000e+00 : f32
      %38 = vector.broadcast %cst_13 : f32 to vector<1x128xf32>
      %39 = arith.subf %37, %38 : vector<1x128xf32>
      %cst_14 = arith.constant 0.000000e+00 : f32
      %40 = vector.broadcast %cst_14 : f32 to vector<1x128xf32>
      %41 = arith.cmpf oge, %39, %40 : vector<1x128xf32>
      %42 = arith.select %41, %27, %arg4 : vector<1x128xi1>, vector<1x128xf32>
      scf.yield %42, %26, %27, %37 : vector<1x128xf32>, vector<1x128xf32>, vector<1x128xf32>, vector<1x128xf32>
    }
    %13 = vector.broadcast %12#2 : vector<1x128xf32> to vector<16x128xf32>
    %14 = arith.subf %2, %13 : vector<16x128xf32>
    %cst_5 = arith.constant 0.000000e+00 : f32
    %15 = vector.broadcast %cst_5 : f32 to vector<16x128xf32>
    %16 = arith.maximumf %14, %15 : vector<16x128xf32>
    %17 = math.log %16 : vector<16x128xf32>
    %cst_6 = arith.constant 0.0666666701 : f32
    %18 = vector.broadcast %cst_6 : f32 to vector<16x128xf32>
    %19 = arith.mulf %18, %17 : vector<16x128xf32>
    %20 = math.exp %19 : vector<16x128xf32>
    %21 = tpu.reciprocal %12#3 : vector<1x128xf32> -> vector<1x128xf32>
    %22 = vector.broadcast %21 : vector<1x128xf32> to vector<16x128xf32>
    %23 = arith.mulf %20, %22 : vector<16x128xf32>
    %c0_7 = arith.constant 0 : index
    %c0_8 = arith.constant 0 : index
    %24 = vector.load %arg2[%c0_7, %c0_8] : memref<16x128xf32, #tpu.memory_space<vmem>>, vector<16x128xf32>
    tpu.vector_store %arg2[%c0_7, %c0_8], %23 {strides = array<i32>} : memref<16x128xf32, #tpu.memory_space<vmem>>, vector<16x128xf32>,
    return
  }
  func.func @transform_0(%arg0: i32) -> (i32, i32) {
    %c0_i32 = arith.constant 0 : i32
    %c0_i32_0 = arith.constant 0 : i32
    return %c0_i32, %arg0 : i32, i32
  }
  func.func @transform_1(%arg0: i32) -> (i32, i32) {
    %c0_i32 = arith.constant 0 : i32
    %c0_i32_0 = arith.constant 0 : i32
    return %c0_i32, %arg0 : i32, i32
  }
}

</mosaic_0001>

<bundles_post_ra>
// kernel: _entmax_bisect_impl.1
= control target key start
LH: loop header
LB: loop body
LE: loop exit
PB: predicated region body
PF: predicated region fallthrough
CT: control target
= control target key end

     0   :  { %s188_s10 = smov 0   ;;  %s202_s0 = inlined_call_operand.vmem [shape: f32[16,128], index: 0, kind: input, shape index: {}]   ;;  %s203_s1 = inlined_call_operand.vmem [shape: f32[16,128], index: 1, kind: output, shape index: {}]  }
   0x1   :  { %v8_v0 = vld [vmem:[%s202_s0] sm:$0xff]  ;;  %v9_v1 = vld [vmem:[%s202_s0 + $0x8] sm:$0xff] }
   0x2   :  { %v10_v2 = vmul.f32 0.5, %v8_v0  ;;  %v11_v3 = vmul.f32 0.5, %v9_v1 }
   0x4   :  { %v12_v4 = vmax.f32 %v10_v2, %v11_v3 }
   0x6   :  { %v13_v5 = vrot.slane %v12_v4, 4 }
   0x8   :  { %v14_v6 = vmax.f32 %v12_v4, %v13_v5 }
   0xa   :  { %v15_v7 = vrot.slane %v14_v6, 2 }
   0xc   :  { %v16_v8 = vmax.f32 %v14_v6, %v15_v7 }
   0xe   :  { %v17_v9 = vrot.slane %v16_v8, 1 }
  0x10   :  { %v18_v10 = vmax.f32 %v16_v8, %v17_v9 }
  0x12   :  { %v111_v11 = vadd.f32 -1.0, %v18_v10   ;;  %v112_v12 = vadd.f32 -0.25, %v18_v10 }
  0x14   :  { %v21_v13 = vsub.f32 %v112_v12, %v111_v11   ;;  %v164_v15 = vmov %v111_v11  }
  0x16   :  { %v160_v14 = vmov %v21_v13  }
  0x17 LB: > { %v32_v14 = vmul.f32 0.5, %v162_v14   ;;  %s27_s10 = sadd.s32 1, %s170_s10   ;;  %s170_s10 = sphi %s188_s10, %s27_s10   ;;  %v166_v15 = vphi %v164_v15, %v57_v15   ;;  %v162_v14 = vphi %v160_v14, %v32_v14  }
  0x18   : > { %p24_p0 = scmp.ge.s32.totalorder %s27_s10, 30  }
  0x19   : > { %v33_v16 = vadd.f32 %v166_v15, %v32_v14 }
  0x1b   : > { %v34_v17 = vsub.f32 %v10_v2, %v33_v16  ;;  %v35_v18 = vsub.f32 %v11_v3, %v33_v16 }
  0x1d   : > { %v36_v19 = vmax.f32 %v34_v17, 0.0  ;;  %v37_v20 = vmax.f32 %v35_v18, 0.0 }
  0x1f   : > { %138 = vlog2.f32 %v36_v19 }
  0x20   : > { %140 = vlog2.f32 %v37_v20 }
  0x25   : > { %v139_v21 = vpop.eup %138 }
  0x26   : > { %v141_v22 = vpop.eup %140  ;;  %v39_v23 = vmul.f32 0.6931472, %v139_v21 }
  0x27   : > { %v41_v24 = vmul.f32 0.6931472, %v141_v22 }
  0x28   : > { %v42_v25 = vmul.f32 0.06666667, %v39_v23 }
  0x29   : > { %v43_v26 = vmul.f32 0.06666667, %v41_v24 }
  0x2a   : > { %v44_v27 = vmul.f32 1.442695, %v42_v25 }
  0x2b   : > { %v46_v28 = vmul.f32 1.442695, %v43_v26 }
  0x2c   : > { %142 = vpow2.f32 %v44_v27 }
  0x2d   : > { %144 = vpow2.f32 %v46_v28 }
  0x32   : > { %v143_v29 = vpop.eup %142 }
  0x33   : > { %v145_v30 = vpop.eup %144 }
  0x34   : > { %v48_v31 = vadd.f32 %v145_v30, %v143_v29 }
  0x36   : > { %v49_v32 = vrot.slane %v48_v31, 4 }
  0x38   : > { %v50_v33 = vadd.f32 %v49_v32, %v48_v31 }
  0x3a   : > { %v51_v34 = vrot.slane %v50_v33, 2 }
  0x3c   : > { %v52_v35 = vadd.f32 %v51_v34, %v50_v33 }
  0x3e   : > { %v53_v36 = vrot.slane %v52_v35, 1 }
  0x40   : > { %v54_v37 = vadd.f32 %v53_v36, %v52_v35 }
  0x41   :  { %26 = sbr.rel (!%p24_p0) target bundleno = 23 (0x17), region = 31 }
  0x42   : > { %v113_v38 = vadd.f32 -1.0, %v54_v37  ;;  %146 = vrcp.f32 (%p24_p0), %v54_v37  ;;  %v83_v41 = vand.u32 (%p24_p0), 2147483648, %v54_v37  ;;  %vm77_vm1 = vweird.f32 (%p24_p0), %v54_v37 }
  0x43   :  { %v81_v43 = vand.u32 (%p24_p0), 2147483647, %v54_v37 }
  0x44   : > { %vm56_vm0 = vcmp.ge.f32.partialorder %v113_v38, 0.0  ;;  %v84_v45 = vor.u32 (%p24_p0), 1.1754944e-38, %v83_v41 }
  0x45   : > { %v57_v15 = vsel %vm56_vm0, %v33_v16, %v166_v15   ;;  %vm82_vm4 = vcmp.eq.f32.partialorder (%p24_p0), %v81_v43, 8.507059e+37 }
  0x48   :  { %v147_v39 = vpop.eup %146 }
  0x49   :  { %v73_v40 = vmul.f32 %v147_v39, %v54_v37  ;;  %vm78_vm2 = vweird.f32 %v147_v39 }
  0x4a   :  { %vm79_vm3 = vmor %vm77_vm1, %vm78_vm2 }
  0x4b   :  { %v74_v42 = vsub.f32 1.0, %v73_v40 }
  0x4d   :  { %v75_v44 = vmul.f32 %v147_v39, %v74_v42 }
  0x4f   :  { %v76_v46 = vadd.f32 %v147_v39, %v75_v44 }
  0x51   :  { %v80_v47 = vsel %vm79_vm3, %v147_v39, %v76_v46 }
  0x52   :  { %v85_v48 = vsel %vm82_vm4, %v84_v45, %v80_v47 }
  0x53   :  { %v86_v49 = vmul.f32 %v143_v29, %v85_v48  ;;  %v87_v50 = vmul.f32 %v145_v30, %v85_v48 }
  0x55   :  { %88 = vst [vmem:[%s203_s1] sm:$0xff] %v86_v49 }
  0x56   :  { %89 = vst [vmem:[%s203_s1 + $0x8] sm:$0xff] %v87_v50 }

</bundles_post_ra>
